<compile_context>
chip_gen: v5e
topology: v5e:2x2
jax: 0.10.0
libtpu: 0.0.40
codegen_flags: <defaults>
</compile_context>

<pallas_src>
import jax
import jax.numpy as jnp
from jax.experimental import pallas as pl
from jax.experimental.pallas import tpu as pltpu


_LANES = 1024                          # lane-dense last dim (multiple of 128)
_TARGET_TILE_BYTES = 2 * 1024 * 1024   # ~2 MiB/tile -> 4 pipelined bufs <= 8 MiB VMEM


def _round_up(x, m):
    return ((x + m - 1) // m) * m


def _scalar_gate_kernel(gate_ref, x_ref, o_ref):
    # gate_ref: f32[1] in SMEM.  x_ref / o_ref: (block_rows, _LANES) VMEM tiles.
    # f32 scalar * x promotes sub-f32 inputs to f32, then casts back to out dtype.
    o_ref[...] = (gate_ref[0] * x_ref[...]).astype(o_ref.dtype)


def scalar_gate(gate, x):
    """ScalarGate forward: gate * x, as a tiled, pipelined Pallas TPU kernel.

    gate: python float / 0-d array (learnable scalar parameter)
    x:    any-rank array (e.g. NCHW activations)
    """
    orig_shape = x.shape
    orig_dtype = x.dtype
    total = x.size
    itemsize = jnp.dtype(orig_dtype).itemsize

    # dtype-aware sublane multiple: f32 -> 8, bf16 -> 16, int8/fp8 -> 32
    sublane = {4: 8, 2: 16, 1: 32}.get(itemsize, 8)

    # rows of the lane-dense (rows, _LANES) slab
    rows = pl.cdiv(total, _LANES)

    # block rows: ~2 MiB per tile, multiple of the sublane packing factor,
    # but never bigger than the (rounded-up) problem itself.
    max_block_rows = max(sublane, _TARGET_TILE_BYTES // (_LANES * itemsize))
    block_rows = min(_round_up(rows, sublane), _round_up(max_block_rows, sublane))

    rows_padded = _round_up(rows, block_rows)
    padded_total = rows_padded * _LANES

    x_flat = x.reshape(-1)
    if padded_total != total:
        x_flat = jnp.pad(x_flat, (0, padded_total - total))
    x2d = x_flat.reshape(rows_padded, _LANES)

    # Keep the learnable scalar in f32 in SMEM; promote per-vreg inside the kernel.
    gate_smem = jnp.asarray(gate, dtype=jnp.float32).reshape(1)

    grid = (rows_padded // block_rows,)

    out2d = pl.pallas_call(
        _scalar_gate_kernel,
        out_shape=jax.ShapeDtypeStruct((rows_padded, _LANES), orig_dtype),
        grid=grid,
        in_specs=[
            pl.BlockSpec(memory_space=pltpu.SMEM),             # scalar gate
            pl.BlockSpec((block_rows, _LANES), lambda i: (i, 0)),
        ],
        out_specs=pl.BlockSpec((block_rows, _LANES), lambda i: (i, 0)),
        compiler_params=pltpu.CompilerParams(
            dimension_semantics=("parallel",),
        ),
    )(gate_smem, x2d)

    return out2d.reshape(-1)[:total].reshape(orig_shape)


if __name__ == "__main__":
    key = jax.random.PRNGKey(0)

    # Learnable scalar, default init = 0.0 (matches nn.Parameter(torch.tensor(0.0)))
    gate = jnp.float32(0.0)

    # Small NCHW input consistent with typical ScalarGate usage.
    x = jax.random.normal(key, (2, 4, 16, 16), dtype=jnp.float32)

    out = jax.block_until_ready(scalar_gate(gate, x))
    assert out.shape == x.shape and out.dtype == x.dtype
    assert jnp.allclose(out, gate * x, atol=1e-6), "mismatch vs reference (gate=0.0)"

    # Non-trivial gate value.
    out2 = jax.block_until_ready(scalar_gate(jnp.float32(1.5), x))
    assert jnp.allclose(out2, 1.5 * x, atol=1e-6), "mismatch vs reference (gate=1.5)"

    # bf16 path: gate stays f32 in SMEM, promoted in-kernel, cast back to bf16.
    xb = x.astype(jnp.bfloat16)
    out3 = jax.block_until_ready(scalar_gate(jnp.float32(1.5), xb))
    assert out3.dtype == jnp.bfloat16
    assert jnp.allclose(out3.astype(jnp.float32),
                        jnp.float32(1.5) * xb.astype(jnp.float32),
                        atol=2e-2), "mismatch vs reference (bf16)"

    print("KERNEL_OK")
</pallas_src>

<mosaic_0001>
module attributes {stable_mosaic.version = 11 : i64} {
  func.func @_scalar_gate_kernel(%arg0: i32, %arg1: memref<1xf32, #tpu.memory_space<smem>>, %arg2: memref<8x1024xf32, #tpu.memory_space<vmem>>, %arg3: memref<8x1024xf32, #tpu.memory_space<vmem>>) attributes {dimension_semantics = [#tpu.dimension_semantics<parallel>], iteration_bounds = array<i64: 1>, scalar_prefetch = 0 : i64, scratch_operands = 0 : i64, tpu.core_type = #tpu.core_type<tc>, window_params = [{transform_indices = @transform_0, window_bounds = array<i64: 1>}, {transform_indices = @transform_1, window_bounds = array<i64: 8, 1024>}, {transform_indices = @transform_2, window_bounds = array<i64: 8, 1024>}]} {
    %c0 = arith.constant 0 : index
    %0 = memref.load %arg1[%c0] : memref<1xf32, #tpu.memory_space<smem>>
    %c0_0 = arith.constant 0 : index
    %c0_1 = arith.constant 0 : index
    %1 = vector.load %arg2[%c0_0, %c0_1] : memref<8x1024xf32, #tpu.memory_space<vmem>>, vector<8x1024xf32>
    %2 = vector.broadcast %0 : f32 to vector<8x1024xf32>
    %3 = arith.mulf %2, %1 : vector<8x1024xf32>
    %c0_2 = arith.constant 0 : index
    %c0_3 = arith.constant 0 : index
    %4 = vector.load %arg3[%c0_2, %c0_3] : memref<8x1024xf32, #tpu.memory_space<vmem>>, vector<8x1024xf32>
    tpu.vector_store %arg3[%c0_2, %c0_3], %3 {strides = array<i32>} : memref<8x1024xf32, #tpu.memory_space<vmem>>, vector<8x1024xf32>,
    return
  }
  func.func @transform_0(%arg0: i32) -> i32 {
    %c0_i32 = arith.constant 0 : i32
    %c0_i32_0 = arith.constant 0 : i32
    return %c0_i32 : i32
  }
  func.func @transform_1(%arg0: i32) -> (i32, i32) {
    %c0_i32 = arith.constant 0 : i32
    %c0_i32_0 = arith.constant 0 : i32
    return %arg0, %c0_i32 : i32, i32
  }
  func.func @transform_2(%arg0: i32) -> (i32, i32) {
    %c0_i32 = arith.constant 0 : i32
    %c0_i32_0 = arith.constant 0 : i32
    return %arg0, %c0_i32 : i32, i32
  }
}

</mosaic_0001>

<bundles_post_ra>
// kernel: tpu_custom_call.1
= control target key start
LH: loop header
LB: loop body
LE: loop exit
PB: predicated region body
PF: predicated region fallthrough
CT: control target
= control target key end

     0   :  { %8 = vsyncpa [#allocation4], 0  ;;  %s150_s0 = inlined_call_operand.<no memory space> [shape: f32[1], index: 0, kind: input, shape index: {}]   ;;  %s151_s1 = inlined_call_operand.hbm [shape: f32[8,1024], index: 1, kind: input, shape index: {}]   ;;  %s152_s2 = inlined_call_operand.hbm [shape: f32[8,1024], index: 2, kind: output, shape index: {}]  }
   0x1   :  { %9 = vsyncpa [#allocation5], 0  ;;  %s17_s11 = sshll.u32 %s151_s1, 4  ;;  %s124_s12 = smov [#allocation3]   ;;  %s18_s11 = int_to_ptr.hbm [resolvable:$true] %s17_s11 }
   0x2   :  { %s19_s13 = sshll.u32 %s124_s12, 4  ;;  %s20_s13 = int_to_ptr.vmem [resolvable:$true] %s19_s13 }
   0x3   :  { %22 = dma.hbm_to_vmem [thread:$0]  %s18_s11, 1024, %s20_s13, [#allocation4]  }
   0x4   :  { %120 = dma.done.wait [#allocation4], 1024  }
   0x5   :  { %121 = vsyncadd [#allocation4], 4294966272  ;;  %v36_v0 = vstv %s150_s0  ;;  %v28_v1 = vld [vmem:[#allocation3] sm:$0xff]  ;;  %v29_v2 = vld [vmem:[#allocation3 + $0x8] sm:$0xff]  ;;  %s125_s1 = smov [#allocation6]   ;;  %s60_s18 = sshll.u32 %s152_s2, 4  ;;  %s61_s18 = int_to_ptr.hbm [resolvable:$true] %s60_s18 }
   0x6   :  { %v30_v3 = vld [vmem:[#allocation3 + $0x10] sm:$0xff]  ;;  %v37_v4 = vmul.f32 %v36_v0, %v28_v1  ;;  %v38_v5 = vmul.f32 %v36_v0, %v29_v2  ;;  %v31_v7 = vld [vmem:[#allocation3 + $0x18] sm:$0xff]  ;;  %v32_v8 = vld [vmem:[#allocation3 + $0x20] sm:$0xff]  ;;  %s58_s0 = sshll.u32 %s125_s1, 4  ;;  %s59_s0 = int_to_ptr.vmem [resolvable:$true] %s58_s0 }
   0x7   :  { %v39_v6 = vmul.f32 %v36_v0, %v30_v3  ;;  %v33_v9 = vld [vmem:[#allocation3 + $0x28] sm:$0xff]  ;;  %v40_v10 = vmul.f32 %v36_v0, %v31_v7  ;;  %v34_v11 = vld [vmem:[#allocation3 + $0x30] sm:$0xff]  ;;  %v41_v12 = vmul.f32 %v36_v0, %v32_v8  ;;  %v35_v13 = vld [vmem:[#allocation3 + $0x38] sm:$0xff] }
   0x8   :  { %45 = vst [vmem:[#allocation6] sm:$0xff] %v37_v4  ;;  %v42_v14 = vmul.f32 %v36_v0, %v33_v9  ;;  %v43_v15 = vmul.f32 %v36_v0, %v34_v11  ;;  %v44_v16 = vmul.f32 %v36_v0, %v35_v13 }
   0x9   :  { %46 = vst [vmem:[#allocation6 + $0x8] sm:$0xff] %v38_v5 }
   0xa   :  { %47 = vst [vmem:[#allocation6 + $0x10] sm:$0xff] %v39_v6 }
   0xb   :  { %48 = vst [vmem:[#allocation6 + $0x18] sm:$0xff] %v40_v10 }
   0xc   :  { %49 = vst [vmem:[#allocation6 + $0x20] sm:$0xff] %v41_v12 }
   0xd   :  { %50 = vst [vmem:[#allocation6 + $0x28] sm:$0xff] %v42_v14 }
   0xe   :  { %51 = vst [vmem:[#allocation6 + $0x30] sm:$0xff] %v43_v15 }
   0xf   :  { %52 = vst [vmem:[#allocation6 + $0x38] sm:$0xff] %v44_v16 }
  0x10   :  { %63 = dma.vmem_to_hbm [thread:$0]  %s59_s0, 1024, %s61_s18, [#allocation5]  }
  0x11   :  { %122 = dma.done.wait [#allocation5], 1024  }
  0x12   :  { %123 = vsyncadd [#allocation5], 4294966272 }
  0x13   :  { %68 = vsyncpa [#allocation4], 1 }
  0x14   :  { %69 = vsyncpa [#allocation5], 1 }

</bundles_post_ra>
